<compile_context>
chip_gen: v7x
topology: tpu7x:2x2x1
jax: 0.10.0
libtpu: 0.0.40
codegen_flags: <defaults>
</compile_context>

<pallas_src>
import functools

import jax
import jax.numpy as jnp
from jax.experimental import pallas as pl
from jax.experimental.pallas import tpu as pltpu


# ----------------------------------------------------------------------------
# Fused kernel: upsample+pad -> concat -> conv3x3+BN+ReLU -> conv3x3+BN+ReLU
# One batch element per grid step; everything channel-major (C, H*W).
# ----------------------------------------------------------------------------
def _up_fused_kernel(x1_ref, x2_ref, ukt_ref, mask_ref,
                     w1_ref, b1_ref, w2_ref, b2_ref, o_ref, *, img_w):
    # x1_ref : (1, C1, H1*W1)   deep feature (to be upsampled), flat spatial
    # x2_ref : (1, C2, H*W)     skip feature, flat spatial
    # ukt_ref: (H1*W1, H*W)     Kronecker(bilinear-x2 upsample, then F.pad)
    # mask_ref:(9, 1, H*W)      per-tap validity mask (conv zero padding)
    # w1_ref : (Cmid, 9*Cin)    conv1 weights (BN1 scale folded in), tap-major
    # b1_ref : (Cmid, 1)        folded BN1 bias
    # w2_ref : (Cout, 9*Cmid)   conv2 weights (BN2 scale folded in)
    # b2_ref : (Cout, 1)        folded BN2 bias
    # o_ref  : (1, Cout, H*W)   output (already channel-major == NCHW)
    HW = x2_ref.shape[2]
    Cout = w2_ref.shape[0]

    x2f = x2_ref[0]                                      # (C2, H*W)
    x1f = x1_ref[0]                                      # (C1, H1*W1)
    # Bilinear x2 upsample (align_corners=True) + pad-to-x2, as one MXU matmul.
    u = jnp.dot(x1f, ukt_ref[...],
                preferred_element_type=jnp.float32)      # (C1, H*W)
    # Channel concat [x2, x1_up] (sublane concat, never touches HBM).
    x = jnp.concatenate([x2f, u], axis=0)                # (Cin, H*W)

    def im2row(op):
        # Build the (9*C, H*W) im2row operand for a 3x3 conv (pad=1): each tap
        # is a lane-roll of the flat-spatial operand (XLU) times a boundary
        # mask (VPU).  Wrap-around values are exactly the ones the mask zeroes.
        rows = []
        for kh in range(3):
            for kw in range(3):
                t = kh * 3 + kw
                shift = (kh - 1) * img_w + (kw - 1)      # flat source offset
                if shift == 0:
                    rows.append(op)                      # center tap: always valid
                else:
                    sh = (-shift) % HW                   # positive roll amount
                    rows.append(pltpu.roll(op, sh, axis=1) * mask_ref[t])
        return jnp.concatenate(rows, axis=0)             # (9*C, H*W)

    # conv1 + BN1 + ReLU:  one (Cmid, 9*Cin) @ (9*Cin, H*W) matmul.
    xt = im2row(x)
    h1 = jnp.maximum(
        jnp.dot(w1_ref[...], xt, preferred_element_type=jnp.float32)
        + b1_ref[...], 0.0)                              # (Cmid, H*W)

    # conv2 + BN2 + ReLU:  one (Cout, 9*Cmid) @ (9*Cmid, H*W) matmul.
    ht = im2row(h1)
    y = jnp.maximum(
        jnp.dot(w2_ref[...], ht, preferred_element_type=jnp.float32)
        + b2_ref[...], 0.0)                              # (Cout, H*W)

    o_ref[...] = y.reshape(1, Cout, HW)


# ----------------------------------------------------------------------------
# Static helpers (shape-dependent only, tiny)
# ----------------------------------------------------------------------------
def _interp_matrix(n_in, n_out):
    """Rows of the align_corners=True bilinear interpolation operator."""
    if n_in == 1:
        return jnp.ones((n_out, 1), jnp.float32)
    pos = jnp.arange(n_out, dtype=jnp.float32) * (n_in - 1) / (n_out - 1)
    lo = jnp.clip(jnp.floor(pos).astype(jnp.int32), 0, n_in - 2)
    frac = pos - lo.astype(jnp.float32)
    m = jnp.zeros((n_out, n_in), jnp.float32)
    m = m.at[jnp.arange(n_out), lo].add(1.0 - frac)
    m = m.at[jnp.arange(n_out), lo + 1].add(frac)
    return m


# ----------------------------------------------------------------------------
# Up module forward: NCHW in, NCHW out (no transposes; pure reshapes only).
# ----------------------------------------------------------------------------
def up_forward(params, x1_nchw, x2_nchw):
    """Mirrors Up.forward(x1, x2)."""
    x1 = x1_nchw.astype(jnp.float32)
    x2 = x2_nchw.astype(jnp.float32)
    N, C1, H1, W1 = x1.shape
    _, C2, H, W = x2.shape
    Cin = C1 + C2
    Cmid = params['w1'].shape[-1]
    Cout = params['w2'].shape[-1]
    HW, H1W1 = H * W, H1 * W1

    # --- upsample (align_corners) + F.pad folded into one static matrix -----
    Ah = _interp_matrix(H1, 2 * H1)                      # (2*H1, H1)
    Aw = _interp_matrix(W1, 2 * W1)                      # (2*W1, W1)
    dY, dX = H - 2 * H1, W - 2 * W1
    Ah_p = jnp.zeros((H, H1), jnp.float32).at[dY // 2:dY // 2 + 2 * H1].set(Ah)
    Aw_p = jnp.zeros((W, W1), jnp.float32).at[dX // 2:dX // 2 + 2 * W1].set(Aw)
    ukt = jnp.einsum('hi,wj->ijhw', Ah_p, Aw_p).reshape(H1W1, HW)

    # --- per-tap validity masks (the conv's zero padding, SAME semantics) ---
    hh = jnp.arange(H)[:, None]
    ww = jnp.arange(W)[None, :]
    mlist = []
    for kh in range(3):
        for kw in range(3):
            dy, dx = kh - 1, kw - 1
            valid = ((hh + dy >= 0) & (hh + dy < H) &
                     (ww + dx >= 0) & (ww + dx < W))
            mlist.append(valid.astype(jnp.float32).reshape(1, HW))
    masks = jnp.stack(mlist, axis=0)                     # (9, 1, H*W)

    # --- weights flattened tap-major (matches im2row row order) with the BN
    #     scale folded in; channel order inside each tap = [x2 ch, x1 ch] ----
    s1 = params['s1'].astype(jnp.float32)
    b1 = params['b1'].reshape(Cmid, 1).astype(jnp.float32)
    s2 = params['s2'].astype(jnp.float32)
    b2 = params['b2'].reshape(Cout, 1).astype(jnp.float32)
    # (3,3,Cin,Cmid) -> (Cmid,3,3,Cin) -> (Cmid, 9*Cin), scaled by BN1 gamma/std.
    w1f = jnp.transpose(params['w1'], (3, 0, 1, 2)).reshape(Cmid, 9 * Cin)
    w1f = w1f * s1[:, None]
    w2f = jnp.transpose(params['w2'], (3, 0, 1, 2)).reshape(Cout, 9 * Cmid)
    w2f = w2f * s2[:, None]

    # channel-major, flat-spatial (lane-dense) activations; pure reshapes.
    x1f = x1.reshape(N, C1, H1W1)
    x2f = x2.reshape(N, C2, HW)

    flops = N * 2 * HW * (C1 * H1W1 + 9 * Cin * Cmid + 9 * Cmid * Cout)
    bytes_accessed = 4 * (x1f.size + x2f.size + ukt.size + masks.size +
                          w1f.size + b1.size + w2f.size + b2.size +
                          N * Cout * HW)

    # TODO(synk): for production U-Net sizes, tile the grid over output rows
    # (2-row halo) so blocks fit v7x's 64 MiB VMEM even at batch 1; at these
    # test shapes one image per grid step is already tiny.
    out = pl.pallas_call(
        functools.partial(_up_fused_kernel, img_w=W),
        out_shape=jax.ShapeDtypeStruct((N, Cout, HW), jnp.float32),
        grid=(N,),
        in_specs=[
            pl.BlockSpec((1, C1, H1W1), lambda n: (n, 0, 0)),
            pl.BlockSpec((1, C2, HW), lambda n: (n, 0, 0)),
            pl.BlockSpec((H1W1, HW), lambda n: (0, 0)),
            pl.BlockSpec((9, 1, HW), lambda n: (0, 0, 0)),
            pl.BlockSpec((Cmid, 9 * Cin), lambda n: (0, 0)),
            pl.BlockSpec((Cmid, 1), lambda n: (0, 0)),
            pl.BlockSpec((Cout, 9 * Cmid), lambda n: (0, 0)),
            pl.BlockSpec((Cout, 1), lambda n: (0, 0)),
        ],
        out_specs=pl.BlockSpec((1, Cout, HW), lambda n: (n, 0, 0)),
        compiler_params=pltpu.CompilerParams(
            dimension_semantics=("parallel",)),
        cost_estimate=pl.CostEstimate(
            flops=flops, transcendentals=0, bytes_accessed=bytes_accessed),
    )(x1f, x2f, ukt, masks, w1f, b1, w2f, b2)

    return out.reshape(N, Cout, H, W)                    # already NCHW


# ----------------------------------------------------------------------------
# Parameters (BatchNorm folded with eval-mode running stats)
# ----------------------------------------------------------------------------
def make_up_params(key, in_channels, out_channels):
    mid_channels = in_channels // 2
    ks = jax.random.split(key, 12)
    eps = 1e-5

    def bn_fold(conv_b, gamma, beta, mean, var):
        scale = gamma / jnp.sqrt(var + eps)
        bias = scale * (conv_b - mean) + beta
        return scale, bias

    w1 = 0.1 * jax.random.normal(ks[0], (3, 3, in_channels, mid_channels), jnp.float32)
    cb1 = 0.1 * jax.random.normal(ks[1], (mid_channels,), jnp.float32)
    g1 = 1.0 + 0.1 * jax.random.normal(ks[2], (mid_channels,), jnp.float32)
    be1 = 0.1 * jax.random.normal(ks[3], (mid_channels,), jnp.float32)
    m1 = 0.1 * jax.random.normal(ks[4], (mid_channels,), jnp.float32)
    v1 = jax.random.uniform(ks[5], (mid_channels,), jnp.float32, 0.5, 1.5)
    s1, b1 = bn_fold(cb1, g1, be1, m1, v1)

    w2 = 0.1 * jax.random.normal(ks[6], (3, 3, mid_channels, out_channels), jnp.float32)
    cb2 = 0.1 * jax.random.normal(ks[7], (out_channels,), jnp.float32)
    g2 = 1.0 + 0.1 * jax.random.normal(ks[8], (out_channels,), jnp.float32)
    be2 = 0.1 * jax.random.normal(ks[9], (out_channels,), jnp.float32)
    m2 = 0.1 * jax.random.normal(ks[10], (out_channels,), jnp.float32)
    v2 = jax.random.uniform(ks[11], (out_channels,), jnp.float32, 0.5, 1.5)
    s2, b2 = bn_fold(cb2, g2, be2, m2, v2)

    return dict(w1=w1, s1=s1, b1=b1, w2=w2, s2=s2, b2=b2)


# ----------------------------------------------------------------------------
# Pure-JAX reference (for correctness checking)
# ----------------------------------------------------------------------------
def upsample_bilinear_x2_ac(x):  # x: (N, H, W, C) NHWC
    N, H, W, C = x.shape
    Ah = _interp_matrix(H, 2 * H)
    Aw = _interp_matrix(W, 2 * W)
    y = jnp.einsum('hH,nHWc->nhWc', Ah, x)
    y = jnp.einsum('wW,nhWc->nhwc', Aw, y)
    return y


def _ref_conv_bn_relu(x, w, scale, bias):
    y = jax.lax.conv_general_dilated(
        x, w, window_strides=(1, 1), padding='SAME',
        dimension_numbers=('NHWC', 'HWIO', 'NHWC'))
    y = y * scale[None, None, None, :] + bias[None, None, None, :]
    return jnp.maximum(y, 0.0)


def up_forward_ref(params, x1_nchw, x2_nchw):
    x1 = jnp.transpose(x1_nchw, (0, 2, 3, 1)).astype(jnp.float32)
    x2 = jnp.transpose(x2_nchw, (0, 2, 3, 1)).astype(jnp.float32)
    x1 = upsample_bilinear_x2_ac(x1)
    diffY = x2.shape[1] - x1.shape[1]
    diffX = x2.shape[2] - x1.shape[2]
    x1 = jnp.pad(x1, ((0, 0),
                      (diffY // 2, diffY - diffY // 2),
                      (diffX // 2, diffX - diffX // 2),
                      (0, 0)))
    x = jnp.concatenate([x2, x1], axis=-1)
    y = _ref_conv_bn_relu(x, params['w1'], params['s1'], params['b1'])
    y = _ref_conv_bn_relu(y, params['w2'], params['s2'], params['b2'])
    return jnp.transpose(y, (0, 3, 1, 2))


if __name__ == "__main__":
    # Up(in_channels=8, out_channels=4, bilinear=True)
    #   x1: deeper feature (N, in/2, H/2, W/2); x2: skip feature (N, in/2, H, W)
    in_channels, out_channels = 8, 4
    N, H, W = 2, 16, 16

    key = jax.random.PRNGKey(0)
    kp, k1, k2 = jax.random.split(key, 3)
    params = make_up_params(kp, in_channels, out_channels)

    x1 = jax.random.normal(k1, (N, in_channels // 2, H // 2, W // 2), jnp.float32)
    x2 = jax.random.normal(k2, (N, in_channels // 2, H, W), jnp.float32)

    fwd = jax.jit(functools.partial(up_forward, params))
    out = jax.block_until_ready(fwd(x1, x2))

    ref = jax.block_until_ready(up_forward_ref(params, x1, x2))
    assert out.shape == (N, out_channels, H, W), out.shape
    err = float(jnp.max(jnp.abs(out - ref)))
    assert jnp.allclose(out, ref, atol=1e-4, rtol=1e-4), err

    print("KERNEL_OK")
</pallas_src>

<mosaic_0001>
module attributes {stable_mosaic.version = 11 : i64} {
  func.func private @main(%arg0: i32) attributes {dimension_semantics = [#tpu.dimension_semantics<core_parallel>], iteration_bounds = array<i64: 2>, tpu.core_type = #tpu.core_type<sc_scalar_subcore>, window_params = []} {
    return
  }
}

module attributes {stable_mosaic.version = 11 : i64} {
  func.func private @main(%arg0: i32) attributes {dimension_semantics = [#tpu.dimension_semantics<core_parallel>], iteration_bounds = array<i64: 2>, tpu.core_type = #tpu.core_type<sc_scalar_subcore>, window_params = []} {
    return
  }
}

module attributes {stable_mosaic.version = 11 : i64} {
  func.func @_up_fused_kernel(%arg0: i32, %arg1: memref<1x4x64xf32, #tpu.memory_space<vmem>>, %arg2: memref<1x4x256xf32, #tpu.memory_space<vmem>>, %arg3: memref<64x256xf32, #tpu.memory_space<vmem>>, %arg4: memref<9x1x256xf32, #tpu.memory_space<vmem>>, %arg5: memref<4x72xf32, #tpu.memory_space<vmem>>, %arg6: memref<4x1xf32, #tpu.memory_space<vmem>>, %arg7: memref<4x36xf32, #tpu.memory_space<vmem>>, %arg8: memref<4x1xf32, #tpu.memory_space<vmem>>, %arg9: memref<1x4x256xf32, #tpu.memory_space<vmem>>) attributes {dimension_semantics = [#tpu.dimension_semantics<parallel>], iteration_bounds = array<i64: 2>, scalar_prefetch = 0 : i64, scratch_operands = 0 : i64, tpu.core_type = #tpu.core_type<tc>, window_params = [{transform_indices = @transform_0, window_bounds = array<i64: 1, 4, 64>}, {transform_indices = @transform_1, window_bounds = array<i64: 1, 4, 256>}, {pipeline_mode = #tpu.pipeline_mode<synchronous>, transform_indices = @transform_2, window_bounds = array<i64: 64, 256>}, {pipeline_mode = #tpu.pipeline_mode<synchronous>, transform_indices = @transform_3, window_bounds = array<i64: 9, 1, 256>}, {pipeline_mode = #tpu.pipeline_mode<synchronous>, transform_indices = @transform_4, window_bounds = array<i64: 4, 72>}, {pipeline_mode = #tpu.pipeline_mode<synchronous>, transform_indices = @transform_5, window_bounds = array<i64: 4, 1>}, {pipeline_mode = #tpu.pipeline_mode<synchronous>, transform_indices = @transform_6, window_bounds = array<i64: 4, 36>}, {pipeline_mode = #tpu.pipeline_mode<synchronous>, transform_indices = @transform_7, window_bounds = array<i64: 4, 1>}, {transform_indices = @transform_8, window_bounds = array<i64: 1, 4, 256>}]} {
    %c0 = arith.constant 0 : index
    %c0_0 = arith.constant 0 : index
    %c0_1 = arith.constant 0 : index
    %0 = vector.load %arg2[%c0, %c0_0, %c0_1] : memref<1x4x256xf32, #tpu.memory_space<vmem>>, vector<1x4x256xf32>
    %1 = vector.shape_cast %0 : vector<1x4x256xf32> to vector<4x256xf32>
    %c0_2 = arith.constant 0 : index
    %c0_3 = arith.constant 0 : index
    %c0_4 = arith.constant 0 : index
    %2 = vector.load %arg1[%c0_2, %c0_3, %c0_4] : memref<1x4x64xf32, #tpu.memory_space<vmem>>, vector<1x4x64xf32>
    %3 = vector.shape_cast %2 : vector<1x4x64xf32> to vector<4x64xf32>
    %c0_5 = arith.constant 0 : index
    %c0_6 = arith.constant 0 : index
    %4 = vector.load %arg3[%c0_5, %c0_6] : memref<64x256xf32, #tpu.memory_space<vmem>>, vector<64x256xf32>
    %cst = arith.constant dense<0.000000e+00> : vector<4x256xf32>
    %5 = tpu.matmul %3, %4, %cst {dimension_numbers = #tpu.dot_dimension_numbers<[1], [0], [0], [1], [0, 0, 1, 1], [], []>} : vector<4x64xf32>, vector<64x256xf32>, vector<4x256xf32> -> vector<4x256xf32>
    %6 = tpu.concatenate %1, %5 in 0 : vector<4x256xf32>, vector<4x256xf32> -> vector<8x256xf32>
    %c17_i32 = arith.constant 17 : i32
    %7 = tpu.dynamic_rotate %6 by %c17_i32 dim 1 : vector<8x256xf32>, i32 -> vector<8x256xf32>
    %c0_7 = arith.constant 0 : index
    %c0_8 = arith.constant 0 : index
    %c0_9 = arith.constant 0 : index
    %8 = vector.load %arg4[%c0_7, %c0_8, %c0_9] : memref<9x1x256xf32, #tpu.memory_space<vmem>>, vector<1x1x256xf32>
    %9 = vector.shape_cast %8 : vector<1x1x256xf32> to vector<1x256xf32>
    %10 = vector.broadcast %9 : vector<1x256xf32> to vector<8x256xf32>
    %11 = arith.mulf %7, %10 : vector<8x256xf32>
    %c16_i32 = arith.constant 16 : i32
    %12 = tpu.dynamic_rotate %6 by %c16_i32 dim 1 : vector<8x256xf32>, i32 -> vector<8x256xf32>
    %c1 = arith.constant 1 : index
    %c0_10 = arith.constant 0 : index
    %c0_11 = arith.constant 0 : index
    %13 = vector.load %arg4[%c1, %c0_10, %c0_11] : memref<9x1x256xf32, #tpu.memory_space<vmem>>, vector<1x1x256xf32>
    %14 = vector.shape_cast %13 : vector<1x1x256xf32> to vector<1x256xf32>
    %15 = vector.broadcast %14 : vector<1x256xf32> to vector<8x256xf32>
    %16 = arith.mulf %12, %15 : vector<8x256xf32>
    %c15_i32 = arith.constant 15 : i32
    %17 = tpu.dynamic_rotate %6 by %c15_i32 dim 1 : vector<8x256xf32>, i32 -> vector<8x256xf32>
    %c2 = arith.constant 2 : index
    %c0_12 = arith.constant 0 : index
    %c0_13 = arith.constant 0 : index
    %18 = vector.load %arg4[%c2, %c0_12, %c0_13] : memref<9x1x256xf32, #tpu.memory_space<vmem>>, vector<1x1x256xf32>
    %19 = vector.shape_cast %18 : vector<1x1x256xf32> to vector<1x256xf32>
    %20 = vector.broadcast %19 : vector<1x256xf32> to vector<8x256xf32>
    %21 = arith.mulf %17, %20 : vector<8x256xf32>
    %c1_i32 = arith.constant 1 : i32
    %22 = tpu.dynamic_rotate %6 by %c1_i32 dim 1 : vector<8x256xf32>, i32 -> vector<8x256xf32>
    %c3 = arith.constant 3 : index
    %c0_14 = arith.constant 0 : index
    %c0_15 = arith.constant 0 : index
    %23 = vector.load %arg4[%c3, %c0_14, %c0_15] : memref<9x1x256xf32, #tpu.memory_space<vmem>>, vector<1x1x256xf32>
    %24 = vector.shape_cast %23 : vector<1x1x256xf32> to vector<1x256xf32>
    %25 = vector.broadcast %24 : vector<1x256xf32> to vector<8x256xf32>
    %26 = arith.mulf %22, %25 : vector<8x256xf32>
    %c255_i32 = arith.constant 255 : i32
    %27 = tpu.dynamic_rotate %6 by %c255_i32 dim 1 : vector<8x256xf32>, i32 -> vector<8x256xf32>
    %c5 = arith.constant 5 : index
    %c0_16 = arith.constant 0 : index
    %c0_17 = arith.constant 0 : index
    %28 = vector.load %arg4[%c5, %c0_16, %c0_17] : memref<9x1x256xf32, #tpu.memory_space<vmem>>, vector<1x1x256xf32>
    %29 = vector.shape_cast %28 : vector<1x1x256xf32> to vector<1x256xf32>
    %30 = vector.broadcast %29 : vector<1x256xf32> to vector<8x256xf32>
    %31 = arith.mulf %27, %30 : vector<8x256xf32>
    %c241_i32 = arith.constant 241 : i32
    %32 = tpu.dynamic_rotate %6 by %c241_i32 dim 1 : vector<8x256xf32>, i32 -> vector<8x256xf32>
    %c6 = arith.constant 6 : index
    %c0_18 = arith.constant 0 : index
    %c0_19 = arith.constant 0 : index
    %33 = vector.load %arg4[%c6, %c0_18, %c0_19] : memref<9x1x256xf32, #tpu.memory_space<vmem>>, vector<1x1x256xf32>
    %34 = vector.shape_cast %33 : vector<1x1x256xf32> to vector<1x256xf32>
    %35 = vector.broadcast %34 : vector<1x256xf32> to vector<8x256xf32>
    %36 = arith.mulf %32, %35 : vector<8x256xf32>
    %c240_i32 = arith.constant 240 : i32
    %37 = tpu.dynamic_rotate %6 by %c240_i32 dim 1 : vector<8x256xf32>, i32 -> vector<8x256xf32>
    %c7 = arith.constant 7 : index
    %c0_20 = arith.constant 0 : index
    %c0_21 = arith.constant 0 : index
    %38 = vector.load %arg4[%c7, %c0_20, %c0_21] : memref<9x1x256xf32, #tpu.memory_space<vmem>>, vector<1x1x256xf32>
    %39 = vector.shape_cast %38 : vector<1x1x256xf32> to vector<1x256xf32>
    %40 = vector.broadcast %39 : vector<1x256xf32> to vector<8x256xf32>
    %41 = arith.mulf %37, %40 : vector<8x256xf32>
    %c239_i32 = arith.constant 239 : i32
    %42 = tpu.dynamic_rotate %6 by %c239_i32 dim 1 : vector<8x256xf32>, i32 -> vector<8x256xf32>
    %c8 = arith.constant 8 : index
    %c0_22 = arith.constant 0 : index
    %c0_23 = arith.constant 0 : index
    %43 = vector.load %arg4[%c8, %c0_22, %c0_23] : memref<9x1x256xf32, #tpu.memory_space<vmem>>, vector<1x1x256xf32>
    %44 = vector.shape_cast %43 : vector<1x1x256xf32> to vector<1x256xf32>
    %45 = vector.broadcast %44 : vector<1x256xf32> to vector<8x256xf32>
    %46 = arith.mulf %42, %45 : vector<8x256xf32>
    %47 = tpu.concatenate %11, %16, %21, %26, %6, %31, %36, %41, %46 in 0 : vector<8x256xf32>, vector<8x256xf32>, vector<8x256xf32>, vector<8x256xf32>, vector<8x256xf32>, vector<8x256xf32>, vector<8x256xf32>, vector<8x256xf32>, vector<8x256xf32> -> vector<72x256xf32>
    %c0_24 = arith.constant 0 : index
    %c0_25 = arith.constant 0 : index
    %48 = vector.load %arg5[%c0_24, %c0_25] : memref<4x72xf32, #tpu.memory_space<vmem>>, vector<4x72xf32>
    %cst_26 = arith.constant dense<0.000000e+00> : vector<4x256xf32>
    %49 = tpu.matmul %48, %47, %cst_26 {dimension_numbers = #tpu.dot_dimension_numbers<[1], [0], [0], [1], [0, 0, 1, 1], [], []>} : vector<4x72xf32>, vector<72x256xf32>, vector<4x256xf32> -> vector<4x256xf32>
    %c0_27 = arith.constant 0 : index
    %c0_28 = arith.constant 0 : index
    %50 = vector.load %arg6[%c0_27, %c0_28] : memref<4x1xf32, #tpu.memory_space<vmem>>, vector<4x1xf32>
    %51 = vector.broadcast %50 : vector<4x1xf32> to vector<4x256xf32>
    %52 = arith.addf %49, %51 : vector<4x256xf32>
    %cst_29 = arith.constant 0.000000e+00 : f32
    %53 = vector.broadcast %cst_29 : f32 to vector<4x256xf32>
    %54 = arith.maximumf %52, %53 : vector<4x256xf32>
    %c17_i32_30 = arith.constant 17 : i32
    %55 = tpu.dynamic_rotate %54 by %c17_i32_30 dim 1 : vector<4x256xf32>, i32 -> vector<4x256xf32>
    %c0_31 = arith.constant 0 : index
    %c0_32 = arith.constant 0 : index
    %c0_33 = arith.constant 0 : index
    %56 = vector.load %arg4[%c0_31, %c0_32, %c0_33] : memref<9x1x256xf32, #tpu.memory_space<vmem>>, vector<1x1x256xf32>
    %57 = vector.shape_cast %56 : vector<1x1x256xf32> to vector<1x256xf32>
    %58 = vector.broadcast %57 : vector<1x256xf32> to vector<4x256xf32>
    %59 = arith.mulf %55, %58 : vector<4x256xf32>
    %c16_i32_34 = arith.constant 16 : i32
    %60 = tpu.dynamic_rotate %54 by %c16_i32_34 dim 1 : vector<4x256xf32>, i32 -> vector<4x256xf32>
    %c1_35 = arith.constant 1 : index
    %c0_36 = arith.constant 0 : index
    %c0_37 = arith.constant 0 : index
    %61 = vector.load %arg4[%c1_35, %c0_36, %c0_37] : memref<9x1x256xf32, #tpu.memory_space<vmem>>, vector<1x1x256xf32>
    %62 = vector.shape_cast %61 : vector<1x1x256xf32> to vector<1x256xf32>
    %63 = vector.broadcast %62 : vector<1x256xf32> to vector<4x256xf32>
    %64 = arith.mulf %60, %63 : vector<4x256xf32>
    %c15_i32_38 = arith.constant 15 : i32
    %65 = tpu.dynamic_rotate %54 by %c15_i32_38 dim 1 : vector<4x256xf32>, i32 -> vector<4x256xf32>
    %c2_39 = arith.constant 2 : index
    %c0_40 = arith.constant 0 : index
    %c0_41 = arith.constant 0 : index
    %66 = vector.load %arg4[%c2_39, %c0_40, %c0_41] : memref<9x1x256xf32, #tpu.memory_space<vmem>>, vector<1x1x256xf32>
    %67 = vector.shape_cast %66 : vector<1x1x256xf32> to vector<1x256xf32>
    %68 = vector.broadcast %67 : vector<1x256xf32> to vector<4x256xf32>
    %69 = arith.mulf %65, %68 : vector<4x256xf32>
    %c1_i32_42 = arith.constant 1 : i32
    %70 = tpu.dynamic_rotate %54 by %c1_i32_42 dim 1 : vector<4x256xf32>, i32 -> vector<4x256xf32>
    %c3_43 = arith.constant 3 : index
    %c0_44 = arith.constant 0 : index
    %c0_45 = arith.constant 0 : index
    %71 = vector.load %arg4[%c3_43, %c0_44, %c0_45] : memref<9x1x256xf32, #tpu.memory_space<vmem>>, vector<1x1x256xf32>
    %72 = vector.shape_cast %71 : vector<1x1x256xf32> to vector<1x256xf32>
    %73 = vector.broadcast %72 : vector<1x256xf32> to vector<4x256xf32>
    %74 = arith.mulf %70, %73 : vector<4x256xf32>
    %c255_i32_46 = arith.constant 255 : i32
    %75 = tpu.dynamic_rotate %54 by %c255_i32_46 dim 1 : vector<4x256xf32>, i32 -> vector<4x256xf32>
    %c5_47 = arith.constant 5 : index
    %c0_48 = arith.constant 0 : index
    %c0_49 = arith.constant 0 : index
    %76 = vector.load %arg4[%c5_47, %c0_48, %c0_49] : memref<9x1x256xf32, #tpu.memory_space<vmem>>, vector<1x1x256xf32>
    %77 = vector.shape_cast %76 : vector<1x1x256xf32> to vector<1x256xf32>
    %78 = vector.broadcast %77 : vector<1x256xf32> to vector<4x256xf32>
    %79 = arith.mulf %75, %78 : vector<4x256xf32>
    %c241_i32_50 = arith.constant 241 : i32
    %80 = tpu.dynamic_rotate %54 by %c241_i32_50 dim 1 : vector<4x256xf32>, i32 -> vector<4x256xf32>
    %c6_51 = arith.constant 6 : index
    %c0_52 = arith.constant 0 : index
    %c0_53 = arith.constant 0 : index
    %81 = vector.load %arg4[%c6_51, %c0_52, %c0_53] : memref<9x1x256xf32, #tpu.memory_space<vmem>>, vector<1x1x256xf32>
    %82 = vector.shape_cast %81 : vector<1x1x256xf32> to vector<1x256xf32>
    %83 = vector.broadcast %82 : vector<1x256xf32> to vector<4x256xf32>
    %84 = arith.mulf %80, %83 : vector<4x256xf32>
    %c240_i32_54 = arith.constant 240 : i32
    %85 = tpu.dynamic_rotate %54 by %c240_i32_54 dim 1 : vector<4x256xf32>, i32 -> vector<4x256xf32>
    %c7_55 = arith.constant 7 : index
    %c0_56 = arith.constant 0 : index
    %c0_57 = arith.constant 0 : index
    %86 = vector.load %arg4[%c7_55, %c0_56, %c0_57] : memref<9x1x256xf32, #tpu.memory_space<vmem>>, vector<1x1x256xf32>
    %87 = vector.shape_cast %86 : vector<1x1x256xf32> to vector<1x256xf32>
    %88 = vector.broadcast %87 : vector<1x256xf32> to vector<4x256xf32>
    %89 = arith.mulf %85, %88 : vector<4x256xf32>
    %c239_i32_58 = arith.constant 239 : i32
    %90 = tpu.dynamic_rotate %54 by %c239_i32_58 dim 1 : vector<4x256xf32>, i32 -> vector<4x256xf32>
    %c8_59 = arith.constant 8 : index
    %c0_60 = arith.constant 0 : index
    %c0_61 = arith.constant 0 : index
    %91 = vector.load %arg4[%c8_59, %c0_60, %c0_61] : memref<9x1x256xf32, #tpu.memory_space<vmem>>, vector<1x1x256xf32>
    %92 = vector.shape_cast %91 : vector<1x1x256xf32> to vector<1x256xf32>
    %93 = vector.broadcast %92 : vector<1x256xf32> to vector<4x256xf32>
    %94 = arith.mulf %90, %93 : vector<4x256xf32>
    %95 = tpu.concatenate %59, %64, %69, %74, %54, %79, %84, %89, %94 in 0 : vector<4x256xf32>, vector<4x256xf32>, vector<4x256xf32>, vector<4x256xf32>, vector<4x256xf32>, vector<4x256xf32>, vector<4x256xf32>, vector<4x256xf32>, vector<4x256xf32> -> vector<36x256xf32>
    %c0_62 = arith.constant 0 : index
    %c0_63 = arith.constant 0 : index
    %96 = vector.load %arg7[%c0_62, %c0_63] : memref<4x36xf32, #tpu.memory_space<vmem>>, vector<4x36xf32>
    %cst_64 = arith.constant dense<0.000000e+00> : vector<4x256xf32>
    %97 = tpu.matmul %96, %95, %cst_64 {dimension_numbers = #tpu.dot_dimension_numbers<[1], [0], [0], [1], [0, 0, 1, 1], [], []>} : vector<4x36xf32>, vector<36x256xf32>, vector<4x256xf32> -> vector<4x256xf32>
    %c0_65 = arith.constant 0 : index
    %c0_66 = arith.constant 0 : index
    %98 = vector.load %arg8[%c0_65, %c0_66] : memref<4x1xf32, #tpu.memory_space<vmem>>, vector<4x1xf32>
    %99 = vector.broadcast %98 : vector<4x1xf32> to vector<4x256xf32>
    %100 = arith.addf %97, %99 : vector<4x256xf32>
    %cst_67 = arith.constant 0.000000e+00 : f32
    %101 = vector.broadcast %cst_67 : f32 to vector<4x256xf32>
    %102 = arith.maximumf %100, %101 : vector<4x256xf32>
    %103 = vector.shape_cast %102 : vector<4x256xf32> to vector<1x4x256xf32>
    %c0_68 = arith.constant 0 : index
    %c0_69 = arith.constant 0 : index
    %c0_70 = arith.constant 0 : index
    %104 = vector.load %arg9[%c0_68, %c0_69, %c0_70] : memref<1x4x256xf32, #tpu.memory_space<vmem>>, vector<1x4x256xf32>
    tpu.vector_store %arg9[%c0_68, %c0_69, %c0_70], %103 {strides = array<i32>} : memref<1x4x256xf32, #tpu.memory_space<vmem>>, vector<1x4x256xf32>,
    return
  }
  func.func @transform_0(%arg0: i32) -> (i32, i32, i32) {
    %c0_i32 = arith.constant 0 : i32
    %c0_i32_0 = arith.constant 0 : i32
    %c0_i32_1 = arith.constant 0 : i32
    return %arg0, %c0_i32, %c0_i32_0 : i32, i32, i32
  }
  func.func @transform_1(%arg0: i32) -> (i32, i32, i32) {
    %c0_i32 = arith.constant 0 : i32
    %c0_i32_0 = arith.constant 0 : i32
    %c0_i32_1 = arith.constant 0 : i32
    return %arg0, %c0_i32, %c0_i32_0 : i32, i32, i32
  }
  func.func @transform_2(%arg0: i32) -> (i32, i32) {
    %c0_i32 = arith.constant 0 : i32
    %c0_i32_0 = arith.constant 0 : i32
    %c0_i32_1 = arith.constant 0 : i32
    return %c0_i32, %c0_i32_0 : i32, i32
  }
  func.func @transform_3(%arg0: i32) -> (i32, i32, i32) {
    %c0_i32 = arith.constant 0 : i32
    %c0_i32_0 = arith.constant 0 : i32
    %c0_i32_1 = arith.constant 0 : i32
    %c0_i32_2 = arith.constant 0 : i32
    return %c0_i32, %c0_i32_0, %c0_i32_1 : i32, i32, i32
  }
  func.func @transform_4(%arg0: i32) -> (i32, i32) {
    %c0_i32 = arith.constant 0 : i32
    %c0_i32_0 = arith.constant 0 : i32
    %c0_i32_1 = arith.constant 0 : i32
    return %c0_i32, %c0_i32_0 : i32, i32
  }
  func.func @transform_5(%arg0: i32) -> (i32, i32) {
    %c0_i32 = arith.constant 0 : i32
    %c0_i32_0 = arith.constant 0 : i32
    %c0_i32_1 = arith.constant 0 : i32
    return %c0_i32, %c0_i32_0 : i32, i32
  }
  func.func @transform_6(%arg0: i32) -> (i32, i32) {
    %c0_i32 = arith.constant 0 : i32
    %c0_i32_0 = arith.constant 0 : i32
    %c0_i32_1 = arith.constant 0 : i32
    return %c0_i32, %c0_i32_0 : i32, i32
  }
  func.func @transform_7(%arg0: i32) -> (i32, i32) {
    %c0_i32 = arith.constant 0 : i32
    %c0_i32_0 = arith.constant 0 : i32
    %c0_i32_1 = arith.constant 0 : i32
    return %c0_i32, %c0_i32_0 : i32, i32
  }
  func.func @transform_8(%arg0: i32) -> (i32, i32, i32) {
    %c0_i32 = arith.constant 0 : i32
    %c0_i32_0 = arith.constant 0 : i32
    %c0_i32_1 = arith.constant 0 : i32
    return %arg0, %c0_i32, %c0_i32_0 : i32, i32, i32
  }
}

</mosaic_0001>

<bundles_post_ra>
// kernel: up_forward.1
= control target key start
LH: loop header
LB: loop body
LE: loop exit
PB: predicated region body
PF: predicated region fallthrough
CT: control target
= control target key end

     0   :  { %s1096_s27 = smov 0   ;;  %s1458_s0 = inlined_call_operand.vmem [shape: f32[2,4,64], index: 0, kind: input, shape index: {}]   ;;  %s1459_s1 = inlined_call_operand.vmem [shape: f32[2,4,256], index: 1, kind: input, shape index: {}]   ;;  %s1460_s2 = inlined_call_operand.vmem [shape: f32[64,256], index: 2, kind: input, shape index: {}]   ;;  %s1461_s3 = inlined_call_operand.vmem [shape: f32[9,1,256], index: 3, kind: input, shape index: {}]   ;;  %s1462_s4 = inlined_call_operand.vmem [shape: f32[4,72], index: 4, kind: input, shape index: {}]   ;;  %s1463_s5 = inlined_call_operand.vmem [shape: f32[4,1], index: 5, kind: input, shape index: {}]   ;;  %s1464_s6 = inlined_call_operand.vmem [shape: f32[4,36], index: 6, kind: input, shape index: {}]   ;;  %s1465_s7 = inlined_call_operand.vmem [shape: f32[4,1], index: 7, kind: input, shape index: {}]   ;;  %s1466_s8 = inlined_call_operand.vmem [shape: f32[2,4,256], index: 8, kind: output, shape index: {}]  }
   0x1 LB: > { %s947_s28 = sadd.s32 4294967295, %s1039_s27   ;;  %p951_p0 = scmp.ge.s32.totalorder %s1039_s27, 1  ;;  %s1039_s27 = sphi %s1096_s27, %s18_s27  }
   0x2   : > { %p271_p1 = scmp.lt.s32.totalorder %s1039_s27, 3 }
   0x4   : > { %p272_p2 = pnand %p951_p0, %p271_p1 }
   0x5   : > { %v326_v0 = vld [vmem:[%s1460_s2 + $0x8] sm:$0xff] (!%p272_p2)  ;;  %v328_v1 = vld [vmem:[%s1460_s2 + $0x18] sm:$0xff] (!%p272_p2)  ;;  %v325_v2 = vld [vmem:[%s1460_s2] sm:$0xff] (!%p272_p2)  ;;  %v1041_v7 = vmov (!%p272_p2), 0.0   ;;  %p309_p3 = scmp.lt.s32.totalorder (!%p272_p2), %s947_s28, 1  ;;  %vm341_vm0 = vcmask (!%p272_p2), 523264   ;;  %v432_v36 = vlaneseq (!%p272_p2) }
   0x6   : > { %275 = sbr.rel (%p272_p2) target bundleno = 980 (0x3d4), region = 52  ;;  %v973_v3 = vpack.c.bf16 (!%p272_p2), %v328_v1, %v326_v0  ;;  %v327_v4 = vld [vmem:[%s1460_s2 + $0x10] sm:$0xff] (!%p272_p2)  ;;  %v330_v5 = vld [vmem:[%s1460_s2 + $0x28] sm:$0xff] (!%p272_p2)  ;;  %v332_v6 = vld [vmem:[%s1460_s2 + $0x38] sm:$0xff] (!%p272_p2)  ;;  %409 = vmatprep.mubr.f32.mxu0 (!%p272_p2), %v1041_v7  ;;  %680 = vmatprep.mubr.f32.mxu1 (!%p272_p2), %v1041_v7  ;;  %vm425_vm1 = vcmask (!%p272_p2), 1043456   ;;  %s1042_s29 = smov (!%p272_p2), 16  }
   0x7   : > { %v975_v8 = vpack.c.bf16 (!%p272_p2), %v327_v4, %v325_v2  ;;  %v977_v9 = vpack.c.bf16 (!%p272_p2), %v332_v6, %v330_v5  ;;  %v329_v10 = vld [vmem:[%s1460_s2 + $0x20] sm:$0xff] (!%p272_p2)  ;;  %v331_v11 = vld [vmem:[%s1460_s2 + $0x30] sm:$0xff] (!%p272_p2)  ;;  %v334_v12 = vld [vmem:[%s1460_s2 + $0x48] sm:$0xff] (!%p272_p2)  ;;  %s1043_s30 = smov (!%p272_p2), 17   ;;  %s1044_s9 = smov (!%p272_p2), 15   ;;  %v1048_v34 = vmov (!%p272_p2), 0  }
   0x8   : > { %974 = vmatprep.subr.bf16.mxu0 (!%p272_p2), %v973_v3  ;;  %v336_v13 = vld [vmem:[%s1460_s2 + $0x58] sm:$0xff] (!%p272_p2)  ;;  %v979_v14 = vpack.c.bf16 (!%p272_p2), %v331_v11, %v329_v10  ;;  %v333_v16 = vld [vmem:[%s1460_s2 + $0x40] sm:$0xff] (!%p272_p2)  ;;  %v335_v17 = vld [vmem:[%s1460_s2 + $0x50] sm:$0xff] (!%p272_p2)  ;;  %s1045_s10 = smov (!%p272_p2), 1   ;;  %s1046_s11 = smov (!%p272_p2), 127   ;;  %1031 = vset.pattern.permute.xlu0 (!%p272_p2), %v1048_v34  ;;  %v440_v39 = vshrl.u32 (!%p272_p2), %v432_v36, 7 }
   0x9   : > { %976 = vmatpush1.bf16.msra.mxu0 (!%p272_p2), %v975_v8  ;;  %v981_v15 = vpack.c.bf16 (!%p272_p2), %v336_v13, %v334_v12  ;;  %v338_v18 = vld [vmem:[%s1460_s2 + $0x68] sm:$0xff] (!%p272_p2)  ;;  %v340_v19 = vld [vmem:[%s1460_s2 + $0x78] sm:$0xff] (!%p272_p2)  ;;  %v983_v20 = vpack.c.bf16 (!%p272_p2), %v335_v17, %v333_v16  ;;  %v337_v22 = vld [vmem:[%s1460_s2 + $0x60] sm:$0xff] (!%p272_p2)  ;;  %s1047_s12 = smov (!%p272_p2), 113   ;;  %s1049_s13 = smov (!%p272_p2), 112   ;;  %v1209_v40 = vand.u32 (!%p272_p2), 127, %v432_v36 }
   0xa   : > { %978 = vmatprep.subr.bf16.mxu0 (!%p272_p2), %v977_v9  ;;  %v985_v21 = vpack.c.bf16 (!%p272_p2), %v340_v19, %v338_v18  ;;  %v339_v23 = vld [vmem:[%s1460_s2 + $0x70] sm:$0xff] (!%p272_p2)  ;;  %s1050_s14 = smov (!%p272_p2), 111   ;;  %v606_v35 = vld [vmem:[%s1463_s5] sm:$0xf] (!%p272_p2)  ;;  %v1211_v42 = vsub.s32 (!%p272_p2), 0, %v440_v39  ;;  %v1213_v44 = vsub.s32 (!%p272_p2), 1, %v440_v39 }
   0xb   : > { %v987_v24 = vpack.c.bf16 (!%p272_p2), %v339_v23, %v337_v22  ;;  %v958_v45 = vld [vmem:[%s1461_s3 + $0x2] sm:$0x3] (!%p272_p2)  ;;  %vm455_vm2 = vcmp.lt.s32.totalorder (!%p272_p2), %v1209_v40, 16  ;;  %v960_v46 = vld [vmem:[%s1461_s3 + $0x6] sm:$0x3] (!%p272_p2)  ;;  %vm477_vm3 = vcmp.lt.s32.totalorder (!%p272_p2), %v1209_v40, 15 }
   0xc   : > { %v437_v47 = vld [vmem:[%s1461_s3] sm:$0x3] (!%p272_p2)  ;;  %v1226_v48 = vrot.slane (!%p272_p2), %v958_v45, %v1211_v42  ;;  %v959_v50 = vld [vmem:[%s1461_s3 + $0x4] sm:$0x3] (!%p272_p2)  ;;  %v1232_v52 = vrot.slane (!%p272_p2), %v958_v45, %v1213_v44  ;;  %vm499_vm4 = vcmp.lt.s32.totalorder (!%p272_p2), %v1209_v40, 1  ;;  %v1244_v56 = vrot.slane (!%p272_p2), %v960_v46, %v1213_v44 }
   0xd   : > { %s1468_s28 = smov (!%p309_p3, %s947_s28), 1  ;;  %980 = vmatpush1.bf16.msra.mxu0 %v979_v14  ;;  %v961_v55 = vld [vmem:[%s1461_s3 + $0xa] sm:$0x3]  ;;  %vm434_vm5 = vcmp.lt.s32.totalorder %v1209_v40, 17  ;;  %v1248_v57 = vrot.slane %v437_v47, %v1211_v42  ;;  %v1251_v58 = vrot.slane %v437_v47, %v1213_v44  ;;  %v1254_v59 = vrot.slane %v959_v50, %v1213_v44  ;;  %v962_v23 = vld [vmem:[%s1461_s3 + $0xc] sm:$0x3] }
   0xe   : > { %982 = vmatprep.subr.bf16.mxu0 %v981_v15  ;;  %s952_s19 = sshll.u32 %s1468_s28, 2  ;;  %s971_s23 = sshll.u32 %s1468_s28, 3  ;;  %v1257_v60 = vrot.slane %v960_v46, %v1211_v42  ;;  %vm521_vm6 = vcmp.lt.s32.totalorder %v1209_v40, 127  ;;  %v1262_v0 = vrot.slane %v961_v55, %v1213_v44  ;;  %v1279_v10 = vrot.slane %v959_v50, %v1211_v42 }
   0xf   : > { %s312_s22 = scalar_lea.vmem %s1458_s0, %s952_s19  ;;  %s317_s26 = scalar_lea.vmem %s1459_s1, %s971_s23  ;;  %v1286_v18 = vrot.slane %v961_v55, %v1211_v42  ;;  %vm543_vm7 = vcmp.lt.s32.totalorder %v1209_v40, 113  ;;  %vm565_vm8 = vcmp.lt.s32.totalorder %v1209_v40, 112  ;;  %vm587_vm9 = vcmp.lt.s32.totalorder %v1209_v40, 111 }
  0x10   : > { %v324_v25 = vld [vmem:[%s312_s22] sm:$0xf]  ;;  %vm612_vm10 = vcmask 588800   ;;  %vm792_vm11 = vcmask 293888  }
  0x11   : > { %984 = vmatpush1.bf16.msra.mxu0 %v983_v20  ;;  %v323_v26 = vld [vmem:[%s317_s26] sm:$0xff] }
  0x12   : > { %986 = vmatprep.subr.bf16.mxu0 %v985_v21  ;;  %v417_v30 = vcombine.high %v323_v26, %v323_v26 }
  0x15   : > { %988 = vmatpush1.bf16.msra.mxu0 %v987_v24 }
  0x18   : > { %957 = vmatmul.mubr.msk.f32.vlgmr.msra.gmra.mrb[0].mxu0 %vm341_vm0, %v324_v25  ;;  %v963_v25 = vld [vmem:[%s1461_s3 + $0xe] sm:$0x3] }
  0x19   : > { %866 = vmatprep.mubr.f32.mxu0 %v1041_v7  ;;  %v1314_v36 = vrot.slane %v963_v25, %v1213_v44 }
  0xeb   : > { %v411_v27 = vpop.f32.mrb[0].mxu0 }
  0xec   : > { %v421_v28 = vrot.slane %v411_v27, 4  ;;  %v413_v29 = vpop.f32.mrb[1].mxu0 }
  0xed   : > { %v422_v32 = vrot.slane %v413_v29, 4  ;;  %v1303_v29 = vrot.slane %v962_v23, %v1211_v42 }
  0xee   : > { %v1169_v31 = vsel %vm425_vm1, %v323_v26, %v421_v28 }
  0xef   : > { %451 = vrot.lane.b32.xlu1 %v1169_v31, %s1042_s29  ;;  %428 = vrot.lane.b32.xlu0 %v1169_v31, %s1043_s30  ;;  %v1176_v33 = vsel %vm425_vm1, %v417_v30, %v422_v32  ;;  %v1306_v30 = vrot.slane %v962_v23, %v1213_v44 }
  0xf3   : > { %473 = vrot.lane.b32.xlu0 %v1169_v31, %s1044_s9  ;;  %453 = vrot.lane.b32.xlu1 %v1176_v33, %s1042_s29 }
  0xf7   : > { %495 = vrot.lane.b32.xlu0 %v1169_v31, %s1045_s10  ;;  %475 = vrot.lane.b32.xlu1 %v1176_v33, %s1044_s9 }
  0xfb   : > { %497 = vrot.lane.b32.xlu1 %v1176_v33, %s1045_s10  ;;  %430 = vrot.lane.b32.xlu0 %v1176_v33, %s1043_s30 }
  0xff   : > { %519 = vrot.lane.b32.xlu1 %v1176_v33, %s1046_s11  ;;  %517 = vrot.lane.b32.xlu0 %v1169_v31, %s1046_s11 }
 0x103   : > { %541 = vrot.lane.b32.xlu1 %v1176_v33, %s1047_s12  ;;  %539 = vrot.lane.b32.xlu0 %v1169_v31, %s1047_s12 }
 0x107   : > { %563 = vrot.lane.b32.xlu1 %v1176_v33, %s1049_s13  ;;  %561 = vrot.lane.b32.xlu0 %v1169_v31, %s1049_s13 }
 0x10b   : > { %585 = vrot.lane.b32.xlu1 %v1176_v33, %s1050_s14  ;;  %583 = vrot.lane.b32.xlu0 %v1169_v31, %s1050_s14 }
 0x10f   : > { %609 = vperm.xlu0 %1031, %v606_v35   ;;  %v1311_v35 = vrot.slane %v963_v25, %v1211_v42 }
 0x161   : > { %v452_v37 = vpop.permute.xlu1 %451  ;;  %v429_v38 = vpop.permute.xlu0 %428 }
 0x165   : > { %v474_v41 = vpop.permute.xlu0 %473  ;;  %v454_v43 = vpop.permute.xlu1 %453 }
 0x166   : > { %v456_v53 = vsel %vm455_vm2, %v452_v37, %v454_v43  ;;  %v457_v54 = vsel %vm455_vm2, %v454_v43, %v452_v37  ;;  %v964_v37 = vld [vmem:[%s1461_s3 + $0x10] sm:$0x3] }
 0x167   : > { %v471_v61 = vmul.f32 %v1226_v48, %v457_v54  ;;  %v472_v1 = vmul.f32 %v1232_v52, %v456_v53  ;;  %v1330_v47 = vrot.slane %v964_v37, %v1213_v44 }
 0x169   : > { %v496_v49 = vpop.permute.xlu0 %495  ;;  %v476_v51 = vpop.permute.xlu1 %475 }
 0x16a   : > { %v478_v2 = vsel %vm477_vm3, %v474_v41, %v476_v51  ;;  %v479_v11 = vsel %vm477_vm3, %v476_v51, %v474_v41 }
 0x16b   : > { %v494_v12 = vmul.f32 %v1254_v59, %v478_v2  ;;  %v493_v24 = vmul.f32 %v1279_v10, %v479_v11  ;;  %v786_v11 = vld [vmem:[%s1465_s7] sm:$0xf] }
 0x16d   : > { %v498_v62 = vpop.permute.xlu1 %497  ;;  %v431_v63 = vpop.permute.xlu0 %430 }
 0x16e   : > { %v500_v3 = vsel %vm499_vm4, %v496_v49, %v498_v62  ;;  %v435_v4 = vsel %vm434_vm5, %v429_v38, %v431_v63  ;;  %v436_v5 = vsel %vm434_vm5, %v431_v63, %v429_v38  ;;  %v501_v6 = vsel %vm499_vm4, %v498_v62, %v496_v49 }
 0x16f   : > { %v516_v7 = vmul.f32 %v1244_v56, %v500_v3  ;;  %v449_v8 = vmul.f32 %v1248_v57, %v436_v5  ;;  %v450_v9 = vmul.f32 %v1251_v58, %v435_v4  ;;  %v515_v17 = vmul.f32 %v1257_v60, %v501_v6  ;;  %v605_v3 = vld [vmem:[%s1462_s4] sm:$0xf] }
 0x170   : > { %v1337_v63 = vrot.slane %v964_v37, %v1211_v42 }
 0x171   : > { %v520_v13 = vpop.permute.xlu1 %519  ;;  %v518_v14 = vpop.permute.xlu0 %517  ;;  %v989_v15 = vpack.c.bf16 %v472_v1, %v450_v9  ;;  %v991_v16 = vpack.c.bf16 %v471_v61, %v449_v8  ;;  %v993_v22 = vpack.c.bf16 %v516_v7, %v494_v12  ;;  %v995_v32 = vpack.c.bf16 %v515_v17, %v493_v24 }
 0x172   : > { %v523_v19 = vsel %vm521_vm6, %v520_v13, %v518_v14  ;;  %v522_v20 = vsel %vm521_vm6, %v518_v14, %v520_v13 }
 0x173   : > { %v538_v21 = vmul.f32 %v1262_v0, %v523_v19  ;;  %990 = vmatprep.subr.bf16.mxu1 %v989_v15  ;;  %v537_v28 = vmul.f32 %v1286_v18, %v522_v20 }
 0x174   : > { %992 = vmatpush1.bf16.msra.mxu1 %v991_v16 }
 0x175   : > { %v542_v26 = vpop.permute.xlu1 %541  ;;  %994 = vmatprep.subr.bf16.mxu1 %v993_v22  ;;  %v540_v27 = vpop.permute.xlu0 %539  ;;  %v997_v34 = vpack.c.bf16 %v538_v21, %v1176_v33  ;;  %v999_v46 = vpack.c.bf16 %v537_v28, %v1169_v31 }
 0x176   : > { %v544_v38 = vsel %vm543_vm7, %v540_v27, %v542_v26  ;;  %v545_v39 = vsel %vm543_vm7, %v542_v26, %v540_v27 }
 0x177   : > { %v559_v49 = vmul.f32 %v1303_v29, %v544_v38  ;;  %v560_v50 = vmul.f32 %v1306_v30, %v545_v39 }
 0x178   : > { %996 = vmatpush1.bf16.msra.mxu1 %v995_v32 }
 0x179   : > { %v564_v33 = vpop.permute.xlu1 %563  ;;  %998 = vmatprep.subr.bf16.mxu1 %v997_v34  ;;  %v562_v41 = vpop.permute.xlu0 %561 }
 0x17a   : > { %v566_v43 = vsel %vm565_vm8, %v562_v41, %v564_v33  ;;  %v567_v45 = vsel %vm565_vm8, %v564_v33, %v562_v41 }
 0x17b   : > { %v581_v51 = vmul.f32 %v1311_v35, %v566_v43  ;;  %v582_v53 = vmul.f32 %v1314_v36, %v567_v45 }
 0x17c   : > { %1000 = vmatpush1.bf16.msra.mxu1 %v999_v46 }
 0x17d   : > { %v586_v54 = vpop.permute.xlu1 %585  ;;  %v584_v55 = vpop.permute.xlu0 %583  ;;  %v1001_v61 = vpack.c.bf16 %v582_v53, %v560_v50  ;;  %v1003_v62 = vpack.c.bf16 %v581_v51, %v559_v49 }
 0x17e   : > { %v589_v31 = vsel %vm587_vm9, %v586_v54, %v584_v55  ;;  %v588_v44 = vsel %vm587_vm9, %v584_v55, %v586_v54 }
 0x17f   : > { %v604_v1 = vmul.f32 %v1330_v47, %v589_v31  ;;  %1002 = vmatprep.subr.bf16.mxu1 %v1001_v61  ;;  %v603_v2 = vmul.f32 %v1337_v63, %v588_v44 }
 0x180   : > { %1004 = vmatpush1.bf16.msra.mxu1 %v1003_v62 }
 0x181   : > { %632 = vmatprep.subr.mxu1 %v604_v1 }
 0x184   : > { %633 = vmatpush1.msra.mxu1 %v603_v2 }
 0x185   : > { %965 = vmatmul.mubr.msk.f32.vlgmr.msra.gmra.mrb[0].mxu1 %vm612_vm10, %v605_v3 }
 0x18e   : > { %v610_v42 = vpop.permute.xlu0 %609 }
 0x258   : > { %v682_v4 = vpop.f32.mrb[0].mxu1 }
 0x259   : > { %v683_v5 = vadd.f32 %v682_v4, %v610_v42  ;;  %v684_v6 = vpop.f32.mrb[1].mxu1 }
 0x25a   : > { %v685_v8 = vadd.f32 %v684_v6, %v610_v42 }
 0x25b   : > { %v1348_v7 = vmax.f32 %v683_v5, 0.0 }
 0x25c   : > { %v1354_v9 = vmax.f32 %v685_v8, 0.0 }
 0x25d   : > { %713 = vrot.lane.b32.xlu0 %v1348_v7, %s1045_s10  ;;  %697 = vrot.lane.b32.xlu1 %v1348_v7, %s1042_s29 }
 0x261   : > { %689 = vrot.lane.b32.xlu0 %v1348_v7, %s1043_s30  ;;  %699 = vrot.lane.b32.xlu1 %v1354_v9, %s1042_s29 }
 0x265   : > { %705 = vrot.lane.b32.xlu0 %v1348_v7, %s1044_s9  ;;  %715 = vrot.lane.b32.xlu1 %v1354_v9, %s1045_s10 }
 0x269   : > { %721 = vrot.lane.b32.xlu0 %v1348_v7, %s1046_s11  ;;  %691 = vrot.lane.b32.xlu1 %v1354_v9, %s1043_s30 }
 0x26d   : > { %737 = vrot.lane.b32.xlu0 %v1348_v7, %s1049_s13  ;;  %707 = vrot.lane.b32.xlu1 %v1354_v9, %s1044_s9 }
 0x271   : > { %729 = vrot.lane.b32.xlu0 %v1348_v7, %s1047_s12  ;;  %723 = vrot.lane.b32.xlu1 %v1354_v9, %s1046_s11 }
 0x275   : > { %745 = vrot.lane.b32.xlu0 %v1348_v7, %s1050_s14  ;;  %739 = vrot.lane.b32.xlu1 %v1354_v9, %s1049_s13  ;;  %s322_s13 = scalar_lea.vmem %s1466_s8, %s971_s23 }
 0x279   : > { %789 = vperm.xlu0 %1031, %v786_v11   ;;  %731 = vrot.lane.b32.xlu1 %v1354_v9, %s1047_s12 }
 0x27d   : > { %747 = vrot.lane.b32.xlu1 %v1354_v9, %s1050_s14 }
 0x2cf   : > { %v714_v12 = vpop.permute.xlu0 %713  ;;  %v698_v13 = vpop.permute.xlu1 %697 }
 0x2d3   : > { %v690_v14 = vpop.permute.xlu0 %689  ;;  %v700_v15 = vpop.permute.xlu1 %699 }
 0x2d4   : > { %v701_v19 = vsel %vm455_vm2, %v698_v13, %v700_v15  ;;  %v702_v20 = vsel %vm455_vm2, %v700_v15, %v698_v13 }
 0x2d5   : > { %v703_v24 = vmul.f32 %v702_v20, %v1226_v48  ;;  %v704_v25 = vmul.f32 %v701_v19, %v1232_v52 }
 0x2d7   : > { %v706_v16 = vpop.permute.xlu0 %705  ;;  %v716_v17 = vpop.permute.xlu1 %715  ;;  %v755_v33 = vrot.slane %v703_v24, 4  ;;  %v756_v48 = vrot.slane %v704_v25, 4 }
 0x2d8   : > { %v717_v21 = vsel %vm499_vm4, %v714_v12, %v716_v17  ;;  %v718_v22 = vsel %vm499_vm4, %v716_v17, %v714_v12 }
 0x2d9   : > { %v719_v28 = vmul.f32 %v718_v22, %v1257_v60  ;;  %v720_v32 = vmul.f32 %v717_v21, %v1244_v56 }
 0x2db   : > { %v692_v23 = vpop.permute.xlu1 %691  ;;  %v722_v34 = vpop.permute.xlu0 %721  ;;  %v761_v43 = vrot.slane %v719_v28, 4  ;;  %v762_v45 = vrot.slane %v720_v32, 4 }
 0x2dc   : > { %v693_v26 = vsel %vm434_vm5, %v690_v14, %v692_v23  ;;  %v694_v27 = vsel %vm434_vm5, %v692_v23, %v690_v14 }
 0x2dd   : > { %v695_v37 = vmul.f32 %v694_v27, %v1248_v57  ;;  %v696_v38 = vmul.f32 %v693_v26, %v1251_v58 }
 0x2df   : > { %v708_v39 = vpop.permute.xlu1 %707  ;;  %v777_v46 = vsel %vm425_vm1, %v695_v37, %v755_v33  ;;  %v738_v57 = vpop.permute.xlu0 %737  ;;  %v778_v50 = vsel %vm425_vm1, %v696_v38, %v756_v48 }
 0x2e0   : > { %v709_v52 = vsel %vm477_vm3, %v706_v16, %v708_v39  ;;  %v710_v41 = vsel %vm477_vm3, %v708_v39, %v706_v16 }
 0x2e1   : > { %v711_v60 = vmul.f32 %v710_v41, %v1279_v10  ;;  %v712_v56 = vmul.f32 %v709_v52, %v1254_v59 }
 0x2e3   : > { %v779_v58 = vsel %vm425_vm1, %v711_v60, %v761_v43  ;;  %v724_v49 = vpop.permute.xlu1 %723  ;;  %v780_v51 = vsel %vm425_vm1, %v712_v56, %v762_v45  ;;  %v730_v1 = vpop.permute.xlu0 %729 }
 0x2e4   : > { %v725_v53 = vsel %vm521_vm6, %v722_v34, %v724_v49  ;;  %v726_v54 = vsel %vm521_vm6, %v724_v49, %v722_v34  ;;  %v1005_v55 = vpack.c.bf16 %v780_v51, %v778_v50  ;;  %v1007_v10 = vpack.c.bf16 %v779_v58, %v777_v46 }
 0x2e5   : > { %v727_v59 = vmul.f32 %v725_v53, %v1286_v18  ;;  %v728_v61 = vmul.f32 %v726_v54, %v1262_v0 }
 0x2e6   : > { %1006 = vmatprep.subr.bf16.mxu0 %v1005_v55 }
 0x2e7   : > { %1008 = vmatpush1.bf16.msra.mxu0 %v1007_v10  ;;  %v740_v62 = vpop.permute.xlu1 %739  ;;  %v767_v42 = vrot.slane %v727_v59, 4  ;;  %v768_v4 = vrot.slane %v728_v61, 4  ;;  %v746_v13 = vpop.permute.xlu0 %745 }
 0x2e8   : > { %v741_v31 = vsel %vm565_vm8, %v738_v57, %v740_v62  ;;  %v742_v44 = vsel %vm565_vm8, %v740_v62, %v738_v57 }
 0x2e9   : > { %v743_v2 = vmul.f32 %v741_v31, %v1311_v35  ;;  %v744_v3 = vmul.f32 %v742_v44, %v1314_v36  ;;  %v781_v35 = vsel %vm425_vm1, %v1348_v7, %v767_v42  ;;  %v782_v15 = vsel %vm425_vm1, %v1354_v9, %v768_v4  ;;  %v785_v9 = vld [vmem:[%s1464_s6] sm:$0xf] }
 0x2eb   : > { %v732_v5 = vpop.permute.xlu1 %731  ;;  %v773_v6 = vrot.slane %v743_v2, 4  ;;  %v774_v8 = vrot.slane %v744_v3, 4 }
 0x2ec   : > { %v733_v18 = vsel %vm543_vm7, %v730_v1, %v732_v5  ;;  %v734_v0 = vsel %vm543_vm7, %v732_v5, %v730_v1 }
 0x2ed   : > { %v735_v11 = vmul.f32 %v733_v18, %v1303_v29  ;;  %v736_v12 = vmul.f32 %v734_v0, %v1306_v30 }
 0x2ef   : > { %v783_v36 = vsel %vm425_vm1, %v735_v11, %v773_v6  ;;  %v748_v14 = vpop.permute.xlu1 %747  ;;  %v784_v16 = vsel %vm425_vm1, %v736_v12, %v774_v8 }
 0x2f0   : > { %v750_v17 = vsel %vm587_vm9, %v748_v14, %v746_v13  ;;  %v1009_v19 = vpack.c.bf16 %v784_v16, %v782_v15  ;;  %v1011_v20 = vpack.c.bf16 %v783_v36, %v781_v35  ;;  %v749_v30 = vsel %vm587_vm9, %v746_v13, %v748_v14 }
 0x2f1   : > { %v752_v29 = vmul.f32 %v750_v17, %v1330_v47  ;;  %v751_v7 = vmul.f32 %v749_v30, %v1337_v63 }
 0x2f2   : > { %1010 = vmatprep.subr.bf16.mxu0 %v1009_v19 }
 0x2f3   : > { %1012 = vmatpush1.bf16.msra.mxu0 %v1011_v20 }
 0x2f4   : > { %966 = vmatprep.subr.msk.mxu0 %vm425_vm1, %v752_v29 }
 0x2f7   : > { %967 = vmatpush1.msk.msra.mxu0 %vm425_vm1, %v751_v7 }
 0x2f8   : > { %968 = vmatmul.mubr.msk.f32.vlgmr.msra.gmra.mrb[2].mxu0 %vm792_vm11, %v785_v9  ;;  %v790_v21 = vpop.permute.xlu0 %789 }
 0x3cb   : > { %v868_v47 = vpop.f32.mrb[2].mxu0 }
 0x3cc   : > { %v869_v22 = vadd.f32 %v868_v47, %v790_v21  ;;  %v870_v40 = vpop.f32.mrb[3].mxu0 }
 0x3cd   : > { %v871_v23 = vadd.f32 %v870_v40, %v790_v21 }
 0x3ce   : > { %v873_v24 = vmax.f32 %v869_v22, 0.0 }
 0x3cf   : > { %v874_v25 = vmax.f32 %v871_v23, 0.0 }
 0x3d1   : > { %v877_v63 = vcombine.low %v873_v24, %v874_v25 }
 0x3d3   : > { %879 = vst [vmem:[%s322_s13] sm:$0xff] %v877_v63 }
 0x3d4 PF: > { %s18_s27 = sadd.s32 1, %s1039_s27  }
 0x3d5   : > { %p15_p4 = scmp.ge.s32.totalorder %s18_s27, 4  }
 0x3d7   :  { %17 = sbr.rel (!%p15_p4) target bundleno = 1 (0x1), region = 92 }

</bundles_post_ra>
